<compile_context>
chip_gen: v6e
topology: v6e:2x2x1
jax: 0.10.0
libtpu: 0.0.40
codegen_flags: <defaults>
</compile_context>

<pallas_src>
import jax
import jax.numpy as jnp
from jax.experimental import pallas as pl
from jax.experimental.pallas import tpu as pltpu


def _preprocess_kernel(x_ref, zt_ref, out_ref):
    # x_ref  : (1, TN, d)
    # zt_ref : (1, TN, K, q)
    # out_ref: (1, TN, K, d + q)
    q = zt_ref.shape[-1]
    k = zt_ref.shape[2]
    tn = x_ref.shape[1]
    d = x_ref.shape[-1]

    # First q feature lanes: copy Zt tile straight through.
    out_ref[..., :q] = zt_ref[...]

    # Remaining d feature lanes: X broadcast along the K axis
    # (equivalent of X[:, :, None, :].expand(-1, -1, K, -1)).
    x = x_ref[...]                                        # (1, TN, d)
    out_ref[..., q:] = jnp.broadcast_to(x[:, :, None, :], (1, tn, k, d))


def _round_up(x, m):
    return ((x + m - 1) // m) * m


def _choose_row_tile(N, K, d, q, itemsize, vmem_budget_bytes):
    """Largest N-row tile (multiple of 8, or == N) whose double-buffered,
    lane/sublane-padded VMEM footprint stays under vmem_budget_bytes."""
    LANE, SUB = 128, 8
    x_row = _round_up(d, LANE) * itemsize
    zt_row = _round_up(K, SUB) * _round_up(q, LANE) * itemsize
    out_row = _round_up(K, SUB) * _round_up(d + q, LANE) * itemsize
    per_row = 2 * (x_row + zt_row + out_row)              # x2: double buffering
    cap = max(SUB, vmem_budget_bytes // per_row)
    if N <= cap:
        return N
    cap = (cap // SUB) * SUB
    # Prefer an even divisor of N (no ragged trailing block); fall back to cap.
    for t in range(cap, SUB - 1, -SUB):
        if N % t == 0:
            return t
    return cap


def preprocess(X, Zt, *, row_tile=None, vmem_budget_bytes=8 * 1024 * 1024):
    """X: [B, N, d], Zt: [B, N, K, q] -> ZcondX: [B, N, K, d+q]"""
    B, N, d = X.shape
    Bz, Nz, K, q = Zt.shape
    assert B == Bz and N == Nz, "X and Zt must share B and N"
    assert X.dtype == Zt.dtype

    itemsize = jnp.dtype(Zt.dtype).itemsize
    tn = row_tile if row_tile is not None else _choose_row_tile(
        N, K, d, q, itemsize, vmem_budget_bytes)
    tn = min(tn, N)
    # (8,128) rule applies to X's (TN, d) trailing dims: TN multiple of 8 or == N.
    assert tn == N or tn % 8 == 0, f"row tile {tn} must be a multiple of 8 or equal N"

    n_tiles = pl.cdiv(N, tn)
    out_shape = jax.ShapeDtypeStruct((B, N, K, d + q), Zt.dtype)

    return pl.pallas_call(
        _preprocess_kernel,
        out_shape=out_shape,
        grid_spec=pl.GridSpec(
            grid=(B, n_tiles),
            in_specs=[
                pl.BlockSpec((1, tn, d), lambda b, n: (b, n, 0)),
                pl.BlockSpec((1, tn, K, q), lambda b, n: (b, n, 0, 0)),
            ],
            out_specs=pl.BlockSpec((1, tn, K, d + q), lambda b, n: (b, n, 0, 0)),
        ),
        compiler_params=pltpu.CompilerParams(
            dimension_semantics=("parallel", "parallel"),
            vmem_limit_bytes=32 * 1024 * 1024,   # safe on v5e/v6e/v7x
        ),
    )(X, Zt)


def _reference(X, Zt):
    B, N, d = X.shape
    K = Zt.shape[2]
    X_exp = jnp.broadcast_to(X[:, :, None, :], (B, N, K, d))
    return jnp.concatenate([Zt, X_exp], axis=3)


if __name__ == "__main__":
    key = jax.random.PRNGKey(0)

    # Test 1: small shapes matching the module's forward contract.
    B, N, K, q, d = 2, 8, 4, 6, 4
    kx, kz = jax.random.split(key)
    X = jax.random.normal(kx, (B, N, d), dtype=jnp.float32)
    Zt = jax.random.normal(kz, (B, N, K, q), dtype=jnp.float32)

    out = jax.block_until_ready(preprocess(X, Zt))
    ref = _reference(X, Zt)
    assert out.shape == (B, N, K, d + q), out.shape
    assert out.dtype == Zt.dtype
    assert jnp.allclose(out, ref), "mismatch vs reference (test 1)"

    # Test 2: larger N with an explicit row tile to exercise the N-tiled grid.
    B2, N2, K2, q2, d2 = 2, 256, 4, 6, 4
    kx2, kz2 = jax.random.split(jax.random.PRNGKey(0), 2)
    X2 = jax.random.normal(kx2, (B2, N2, d2), dtype=jnp.float32)
    Zt2 = jax.random.normal(kz2, (B2, N2, K2, q2), dtype=jnp.float32)

    out2 = jax.block_until_ready(preprocess(X2, Zt2, row_tile=64))
    ref2 = _reference(X2, Zt2)
    assert out2.shape == (B2, N2, K2, d2 + q2), out2.shape
    assert jnp.allclose(out2, ref2), "mismatch vs reference (test 2)"

    print("KERNEL_OK")
</pallas_src>

<mosaic_0001>
module attributes {stable_mosaic.version = 11 : i64} {
  func.func @_preprocess_kernel(%arg0: i32, %arg1: i32, %arg2: memref<1x8x4xf32, #tpu.memory_space<vmem>>, %arg3: memref<1x8x4x6xf32, #tpu.memory_space<vmem>>, %arg4: memref<1x8x4x10xf32, #tpu.memory_space<vmem>>) attributes {dimension_semantics = [#tpu.dimension_semantics<parallel>, #tpu.dimension_semantics<parallel>], iteration_bounds = array<i64: 2, 1>, scalar_prefetch = 0 : i64, scratch_operands = 0 : i64, tpu.core_type = #tpu.core_type<tc>, window_params = [{transform_indices = @transform_0, window_bounds = array<i64: 1, 8, 4>}, {transform_indices = @transform_1, window_bounds = array<i64: 1, 8, 4, 6>}, {transform_indices = @transform_2, window_bounds = array<i64: 1, 8, 4, 10>}]} {
    %c0 = arith.constant 0 : index
    %c0_0 = arith.constant 0 : index
    %c0_1 = arith.constant 0 : index
    %c0_2 = arith.constant 0 : index
    %0 = vector.load %arg3[%c0, %c0_0, %c0_1, %c0_2] : memref<1x8x4x6xf32, #tpu.memory_space<vmem>>, vector<1x8x4x6xf32>
    %c0_3 = arith.constant 0 : index
    %c0_4 = arith.constant 0 : index
    %c0_5 = arith.constant 0 : index
    %c0_6 = arith.constant 0 : index
    %1 = vector.load %arg4[%c0_3, %c0_4, %c0_5, %c0_6] : memref<1x8x4x10xf32, #tpu.memory_space<vmem>>, vector<1x8x4x6xf32>
    tpu.vector_store %arg4[%c0_3, %c0_4, %c0_5, %c0_6], %0 {strides = array<i32>} : memref<1x8x4x10xf32, #tpu.memory_space<vmem>>, vector<1x8x4x6xf32>,
    %c0_7 = arith.constant 0 : index
    %c0_8 = arith.constant 0 : index
    %c0_9 = arith.constant 0 : index
    %2 = vector.load %arg2[%c0_7, %c0_8, %c0_9] : memref<1x8x4xf32, #tpu.memory_space<vmem>>, vector<1x8x4xf32>
    %3 = vector.shape_cast %2 : vector<1x8x4xf32> to vector<1x8x1x4xf32>
    %4 = vector.shape_cast %3 : vector<1x8x1x4xf32> to vector<1x8x1x4xf32>
    %5 = vector.broadcast %4 : vector<1x8x1x4xf32> to vector<1x8x4x4xf32>
    %c0_10 = arith.constant 0 : index
    %c0_11 = arith.constant 0 : index
    %c0_12 = arith.constant 0 : index
    %c6 = arith.constant 6 : index
    %6 = vector.load %arg4[%c0_10, %c0_11, %c0_12, %c6] : memref<1x8x4x10xf32, #tpu.memory_space<vmem>>, vector<1x8x4x4xf32>
    tpu.vector_store %arg4[%c0_10, %c0_11, %c0_12, %c6], %5 {strides = array<i32>} : memref<1x8x4x10xf32, #tpu.memory_space<vmem>>, vector<1x8x4x4xf32>,
    return
  }
  func.func @transform_0(%arg0: i32, %arg1: i32) -> (i32, i32, i32) {
    %c0_i32 = arith.constant 0 : i32
    %c0_i32_0 = arith.constant 0 : i32
    return %arg0, %arg1, %c0_i32 : i32, i32, i32
  }
  func.func @transform_1(%arg0: i32, %arg1: i32) -> (i32, i32, i32, i32) {
    %c0_i32 = arith.constant 0 : i32
    %c0_i32_0 = arith.constant 0 : i32
    %c0_i32_1 = arith.constant 0 : i32
    return %arg0, %arg1, %c0_i32, %c0_i32_0 : i32, i32, i32, i32
  }
  func.func @transform_2(%arg0: i32, %arg1: i32) -> (i32, i32, i32, i32) {
    %c0_i32 = arith.constant 0 : i32
    %c0_i32_0 = arith.constant 0 : i32
    %c0_i32_1 = arith.constant 0 : i32
    return %arg0, %arg1, %c0_i32, %c0_i32_0 : i32, i32, i32, i32
  }
}

</mosaic_0001>

<bundles_post_ra>
// kernel: tpu_custom_call.1
= control target key start
LH: loop header
LB: loop body
LE: loop exit
PB: predicated region body
PF: predicated region fallthrough
CT: control target
= control target key end

     0   :  { %7 = vsyncpa [#allocation3], 0  ;;  %s774_s0 = inlined_call_operand.vmem [shape: f32[2,8,4], index: 0, kind: input, shape index: {}]   ;;  %s775_s1 = inlined_call_operand.vmem [shape: f32[2,8,4,6], index: 1, kind: input, shape index: {}]   ;;  %s776_s2 = inlined_call_operand.hbm [shape: f32[2,8,4,10], index: 2, kind: output, shape index: {}]  }
   0x1   :  { %9 = vsyncpa [#allocation3 + $0x1], 0  ;;  %s618_s9 = smov 0   ;;  %s620_s10 = smov 0  }
   0x2   :  { %s622_s11 = smov 0   ;;  %s624_s12 = smov 0  }
   0x3   :  { %s626_s13 = smov 0   ;;  %s628_s14 = smov 0  }
   0x4 LB: > { %s444_s15 = sadd.s32 4294967295, %s596_s14   ;;  %s445_s16 = sadd.s32 4294967294, %s596_s14   ;;  %s596_s14 = sphi %s628_s14, %s15_s14   ;;  %s592_s13 = sphi %s626_s13, %s783_s13   ;;  %s588_s12 = sphi %s624_s12, %s782_s12   ;;  %s584_s11 = sphi %s622_s11, %s781_s11   ;;  %s580_s10 = sphi %s620_s10, %s780_s10   ;;  %s576_s9 = sphi %s618_s9, %s779_s9  }
   0x5   : > { %s27_s17 = sadd.s32 1, %s592_s13  ;;  %s92_s18 = sadd.s32 1, %s584_s11 }
   0x6   : > { %p29_p0 = scmp.ge.s32.totalorder %s27_s17, 2  ;;  %p102_p1 = scmp.ne.s32.totalorder %s584_s11, %s580_s10 }
   0x7   : > { %p103_p2 = scmp.eq.s32.totalorder %s444_s15, 1  ;;  %p108_p3 = scmp.ne.s32.totalorder %s580_s10, %s576_s9 }
   0x8   : > { %s785_s17 = smov (%p29_p0, %s27_s17), 0  ;;  %p109_p5 = scmp.eq.s32.totalorder %s445_s16, 1 }
   0x9   : > { %p658_p4 = por %p103_p2, %p102_p1  ;;  %s87_s20 = ssub.s32 %s592_s13, %s785_s17 }
   0xa   : > { %p448_p6 = scmp.ge.s32.totalorder %s596_s14, 1  ;;  %p90_p7 = scmp.eq.s32.totalorder %s87_s20, 0 }
   0xb   : > { %p665_p8 = por %p109_p5, %p108_p3  ;;  %p150_p9 = scmp.lt.s32.totalorder %s596_s14, 3 }
   0xc   : > { %s671_s22 = scalar_select %p90_p7, %s584_s11, %s92_s18  }
   0xd   : > { %p151_p10 = pnand %p448_p6, %p150_p9 }
   0xe   : > { %p183_p11 = scmp.lt.s32.totalorder (!%p151_p10), %s588_s12, 1  ;;  %s180_s23 = sand.u32 (!%p151_p10), 1, %s580_s10  }
   0xf   : > { %154 = sbr.rel (%p151_p10) target bundleno = 176 (0xb0), region = 28  ;;  %s449_s25 = sshll.u32 (!%p151_p10), %s180_s23, 5 }
  0x10   : > { %s684_s6 = scalar_lea.vmem (!%p151_p10), [#allocation2], %s449_s25  ;;  %s599_s7 = smov (!%p151_p10), 6  }
  0x11   : > { %s459_s8 = sshll.u32 (!%p151_p10), %s588_s12, 9  ;;  %s350_s15 = sshll.u32 (!%p151_p10), %s684_s6, 4  ;;  %s721_s15 = int_to_ptr.vmem [resolvable:$true] %s350_s15 }
  0x12   : > { %s719_s20 = scalar_lea.hbm (!%p151_p10), %s776_s2, %s459_s8  ;;  %s600_s25 = smov (!%p151_p10), [#allocation2]  }
  0x14   : > { %v224_v0 = vlaneseq  ;;  %v598_v1 = vmov 1966171168   ;;  %s184_s24 = scalar_select %p183_p11, %s588_s12, 1  ;;  %vm209_vm0 = vcmask 44032   ;;  %vm325_vm1 = vcmask 76848  }
  0x15   : > { %v222_v2 = vunpack.c.l.s4 %v598_v1  ;;  %s729_s12 = scalar_lea.sflag [#allocation3], %s180_s23 }
  0x16   : > { %v225_v3 = vshrl.u32 %v224_v0, 7  ;;  %s450_s26 = sshll.u32 %s184_s24, 3  ;;  %s458_s27 = sshll.u32 %s184_s24, 5 }
  0x17   : > { %v223_v4 = vunpack.c.0.s8 %v222_v2  ;;  %s189_s30 = scalar_lea.vmem %s774_s0, %s450_s26  ;;  %s198_s5 = scalar_lea.vmem %s775_s1, %s458_s27 }
  0x18   : > { %v271_v6 = vsub.s32 0, %v225_v3  ;;  %v218_v7 = vld [vmem:[%s189_s30] sm:$0xff]  ;;  %v203_v9 = vld [vmem:[%s198_s5 + $0x8] sm:$0xf]  ;;  %v204_v13 = vld [vmem:[%s198_s5 + $0xc] sm:$0xf] }
  0x19   : > { %v226_v5 = vsub.s32 %v223_v4, %v225_v3  ;;  %v201_v8 = vld [vmem:[%s198_s5] sm:$0xf]  ;;  %v220_v11 = vcombine.high %v218_v7, %v218_v7  ;;  %212 = vst.msk [vmem:[%s684_s6 + $0x8] sm:$0xf] %vm209_vm0, %v203_v9  ;;  %v202_v12 = vld [vmem:[%s198_s5 + $0x4] sm:$0xf] }
  0x1a   : > { %210 = vst.msk [vmem:[%s684_s6] sm:$0xf] %vm209_vm0, %v201_v8  ;;  %v205_v14 = vld [vmem:[%s198_s5 + $0x10] sm:$0xf]  ;;  %211 = vst.msk [vmem:[%s684_s6 + $0x4] sm:$0xf] %vm209_vm0, %v202_v12 }
  0x1b   : > { %v227_v10 = vrot.slane %v218_v7, %v226_v5  ;;  %213 = vst.msk [vmem:[%s684_s6 + $0xc] sm:$0xf] %vm209_vm0, %v204_v13  ;;  %214 = vst.msk [vmem:[%s684_s6 + $0x10] sm:$0xf] %vm209_vm0, %v205_v14  ;;  %v206_v15 = vld [vmem:[%s198_s5 + $0x14] sm:$0xf]  ;;  %v234_v18 = vrot.slane %v220_v11, %v226_v5 }
  0x1c   : > { %215 = vst.msk [vmem:[%s684_s6 + $0x14] sm:$0xf] %vm209_vm0, %v206_v15  ;;  %v207_v19 = vld [vmem:[%s198_s5 + $0x18] sm:$0xf]  ;;  %v208_v24 = vld [vmem:[%s198_s5 + $0x1c] sm:$0xf] }
  0x1d   : > { %v243_v16 = vrot.slane %v227_v10, %v226_v5  ;;  %v235_v17 = vcombine.high %v227_v10, %v227_v10  ;;  %216 = vst.msk [vmem:[%s684_s6 + $0x18] sm:$0xf] %vm209_vm0, %v207_v19  ;;  %v236_v23 = vcombine.high %v234_v18, %v234_v18  ;;  %v250_v28 = vrot.slane %v234_v18, %v226_v5  ;;  %s520_s24 = scalar_lea.vmem %s721_s15, 512  ;;  %s524_s26 = sshll.u32 %s600_s25, 4  ;;  %s525_s26 = int_to_ptr.vmem [resolvable:$false] %s524_s26 }
  0x1e   : > { %217 = vst.msk [vmem:[%s684_s6 + $0x1c] sm:$0xf] %vm209_vm0, %v208_v24  ;;  %p521_p12 = scmp.ne.s32.totalorder %s721_s15, %s520_s24  ;;  %s526_s27 = scalar_lea.vmem %s525_s26, 1024 }
  0x1f   : > { %v272_v20 = vrot.slane %v243_v16, %v271_v6  ;;  %v265_v21 = vcombine.high %v243_v16, %v243_v16  ;;  %v257_v22 = vrot.slane %v235_v17, %v226_v5  ;;  %v264_v30 = vrot.slane %v236_v23, %v226_v5  ;;  %p527_p1 = scmp.lt.s32.totalorder %s721_s15, %s525_s26  ;;  %p528_p2 = scmp.lt.s32.totalorder %s526_s27, %s520_s24 }
  0x20   : > { %v288_v31 = vrot.slane %v250_v28, %v271_v6  ;;  %v266_v32 = vcombine.high %v250_v28, %v250_v28  ;;  %p522_p13 = pnand %p521_p12, %p658_p4 }
  0x21   : > { %301 = vrot.lane.b32.xlu0 %v272_v20, %s599_s7  ;;  %v280_v25 = vrot.slane %v265_v21, %v271_v6  ;;  %v276_v26 = vrot.slane %v257_v22, %v271_v6  ;;  %v267_v27 = vcombine.high %v257_v22, %v257_v22  ;;  %v292_v33 = vrot.slane %v264_v30, %v271_v6  ;;  %p529_p3 = por %p528_p2, %p527_p1 }
  0x22   : > { %v268_v34 = vcombine.high %v264_v30, %v264_v30  ;;  %v296_v35 = vrot.slane %v266_v32, %v271_v6  ;;  %p523_p0 = pneg %p522_p13 }
  0x23   : > { %305 = vrot.lane.b32.xlu1 %v280_v25, %s599_s7  ;;  %v284_v29 = vrot.slane %v267_v27, %v271_v6 }
  0x24   : > { %v300_v36 = vrot.slane %v268_v34, %v271_v6  ;;  %p530_p5 = pnand %p529_p3, %p523_p0 }
  0x25   : > { %303 = vrot.lane.b32.xlu0 %v276_v26, %s599_s7 }
  0x27   : > { %307 = vrot.lane.b32.xlu1 %v284_v29, %s599_s7 }
  0x29   : > { %309 = vrot.lane.b32.xlu0 %v288_v31, %s599_s7 }
  0x2b   : > { %311 = vrot.lane.b32.xlu1 %v292_v33, %s599_s7 }
  0x2d   : > { %313 = vrot.lane.b32.xlu0 %v296_v35, %s599_s7 }
  0x2f   : > { %315 = vrot.lane.b32.xlu1 %v300_v36, %s599_s7 }
  0x93   : > { %v302_v37 = vpop.permute.xlu0 %301 }
  0x94   : > { %326 = vst.msk [vmem:[%s684_s6] sm:$0xf] %vm325_vm1, %v302_v37 }
  0x95   : > { %v306_v38 = vpop.permute.xlu1 %305 }
  0x96   : > { %328 = vst.msk [vmem:[%s684_s6 + $0x8] sm:$0xf] %vm325_vm1, %v306_v38 }
  0x97   : > { %v304_v39 = vpop.permute.xlu0 %303 }
  0x98   : > { %327 = vst.msk [vmem:[%s684_s6 + $0x4] sm:$0xf] %vm325_vm1, %v304_v39 }
  0x99   : > { %v308_v40 = vpop.permute.xlu1 %307 }
  0x9a   : > { %329 = vst.msk [vmem:[%s684_s6 + $0xc] sm:$0xf] %vm325_vm1, %v308_v40 }
  0x9b   : > { %v310_v41 = vpop.permute.xlu0 %309 }
  0x9c   : > { %330 = vst.msk [vmem:[%s684_s6 + $0x10] sm:$0xf] %vm325_vm1, %v310_v41 }
  0x9d   : > { %v312_v42 = vpop.permute.xlu1 %311 }
  0x9e   : > { %331 = vst.msk [vmem:[%s684_s6 + $0x14] sm:$0xf] %vm325_vm1, %v312_v42 }
  0x9f   : > { %v314_v43 = vpop.permute.xlu0 %313 }
  0xa0   : > { %332 = vst.msk [vmem:[%s684_s6 + $0x18] sm:$0xf] %vm325_vm1, %v314_v43 }
  0xa1   : > { %v316_v44 = vpop.permute.xlu1 %315 }
  0xa2   : > { %333 = vst.msk [vmem:[%s684_s6 + $0x1c] sm:$0xf] %vm325_vm1, %v316_v44 }
  0xa3   : > { %533 = shalt.err (!%p530_p5)
}
  0xa4   : > { %s534_s23 = scalar_lea.hbm %s719_s20, 512  ;;  %s538_s30 = scalar_lea.hbm %s776_s2, 1024 }
  0xa5   : > { %p535_p6 = scmp.ne.s32.totalorder %s719_s20, %s534_s23  ;;  %p539_p10 = scmp.lt.s32.totalorder %s719_s20, %s776_s2 }
  0xa6   : > { %p540_p11 = scmp.lt.s32.totalorder %s538_s30, %s534_s23 }
  0xa7   : > { %p536_p7 = pnand %p535_p6, %p658_p4 }
  0xa8   : > { %p541_p12 = por %p540_p11, %p539_p10 }
  0xa9   : > { %p537_p9 = pneg %p536_p7 }
  0xab   : > { %p542_p13 = pnand %p541_p12, %p537_p9 }
  0xad   : > { %545 = shalt.err (!%p542_p13)
}
  0xae   : > { %s601_s5 = smov 64   ;;  %s602_s6 = smov 4  }
  0xaf   : > { %460 = dma.vmem_to_hbm [thread:$0]  (%p658_p4), %s721_s15, 512, %s719_s20, %s729_s12, %s601_s5, %s601_s5, %s602_s6  }
  0xb0 PF: > { %p466_p0 = scmp.ge.s32.totalorder %s596_s14, 2  ;;  %s365_s7 = sand.u32 1, %s576_s9  }
  0xb1   : > { %s366_s8 = scalar_lea.sflag [#allocation3], %s365_s7 }
  0xb2   : > { %p463_p1 = pnand %p466_p0, %p665_p8 }
  0xb4   : > { %p464_p2 = pneg %p463_p1 }
  0xb6   : > { %571 = dma.done.wait (%p464_p2), %s366_s8, 512  }
  0xb7   : > { %573 = vsyncadd (%p464_p2), %s366_s8, 4294966784  ;;  %s15_s14 = sadd.s32 1, %s596_s14   ;;  %s779_s9 = smov %s580_s10 }
  0xb8   : > { %p12_p3 = scmp.ge.s32.totalorder %s15_s14, 4   ;;  %s780_s10 = smov %s584_s11 }
  0xb9   : > { %s781_s11 = smov %s671_s22  ;;  %s782_s12 = smov %s592_s13 }
  0xba   : > { %s783_s13 = smov %s785_s17  ;;  %14 = sbr.rel (!%p12_p3) target bundleno = 4 (0x4), region = 66 }
  0xbf   :  { %371 = vsyncpa [#allocation3], 1 }
  0xc0   :  { %373 = vsyncpa [#allocation3 + $0x1], 1 }

</bundles_post_ra>
